<compile_context>
chip_gen: v7x
topology: tpu7x:2x2x1
jax: 0.10.0
libtpu: 0.0.40
codegen_flags: <defaults>
</compile_context>

<pallas_src>
import functools

import jax
import jax.numpy as jnp
from jax.experimental import pallas as pl
from jax.experimental.pallas import tpu as pltpu

EPS = 1e-5
LANES = 128
ACC_ROWS = 64                   # fixed accumulator height (sublane-aligned)
TARGET_BLOCK_BYTES = 4 << 20    # ~4 MiB per input block per pipeline buffer
VMEM_LIMIT_BYTES = 32 << 20     # 2 inputs x 2 buffers x 4 MiB + acc ~= 16 MiB


def _jaccard_kernel(total_n, tail_rows, out_ref, tgt_ref, res_ref, acc_ref):
    i = pl.program_id(0)
    last = pl.num_programs(0) - 1
    tile_rows = out_ref.shape[0]
    acc_rows = acc_ref.shape[0]

    @pl.when(i == 0)
    def _():
        acc_ref[...] = jnp.zeros_like(acc_ref)

    o = out_ref[...].astype(jnp.float32)
    t = tgt_ref[...].astype(jnp.float32)
    nom = t * o
    denom = t + o - nom + EPS
    # NOTE: no "+ EPS" per element; it is added once after the mean (identical
    # math), and zero-padded elements therefore contribute exactly 0 (0/EPS).
    val = nom / denom

    def fold(v):
        # Fold a (tile_rows, 128) tile into the small (acc_rows, 128) accumulator.
        if tile_rows == acc_rows:
            acc_ref[...] += v
        else:
            groups = tile_rows // acc_rows
            acc_ref[...] += v.reshape(groups, acc_rows, LANES).sum(axis=0)

    needs_tail_mask = tail_rows != tile_rows

    @pl.when(i < last)
    def _():
        fold(val)   # lean path: no mask on any step but the last

    @pl.when(i == last)
    def _():
        v = val
        if needs_tail_mask:
            # Only the ragged final block pays for the mask; rows past the end
            # of the input hold garbage (clipped DMA) and must be dropped.
            row = jax.lax.broadcasted_iota(jnp.int32, (tile_rows, LANES), 0)
            v = jnp.where(row < tail_rows, val, 0.0)
        fold(v)
        s = jnp.sum(acc_ref[...], keepdims=True)                   # (1, 1)
        res_ref[...] = -jnp.log(s / jnp.float32(total_n) + EPS)    # (1, 1)


def jaccard_similarity(outputs, targets):
    """Pallas equivalent of JaccardSimilarity(reduction='mean')(outputs, targets)."""
    assert outputs.shape == targets.shape
    total_n = int(outputs.size)

    # Keep f32 / bf16 in their native width (upcast happens in-kernel);
    # anything else is promoted to f32.
    dtype = jnp.dtype(jnp.promote_types(outputs.dtype, targets.dtype))
    if dtype.name not in ("float32", "bfloat16"):
        dtype = jnp.dtype(jnp.float32)

    out_flat = outputs.reshape(-1).astype(dtype)
    tgt_flat = targets.reshape(-1).astype(dtype)

    # Lane alignment: only pad (a full-array copy) when total_n is not a
    # multiple of 128; the common NCHW case skips this entirely. Zero padding
    # contributes exactly 0 to the accumulated sum.
    rem = total_n % LANES
    if rem:
        pad = LANES - rem
        out_flat = jnp.pad(out_flat, (0, pad))
        tgt_flat = jnp.pad(tgt_flat, (0, pad))
    m = out_flat.shape[0] // LANES

    itemsize = dtype.itemsize
    cap_rows = TARGET_BLOCK_BYTES // (LANES * itemsize)   # 8192 f32 / 16384 bf16
    sub = {4: 8, 2: 16, 1: 32}.get(itemsize, 8)

    if m <= cap_rows:
        # Whole (lane-aligned) array in a single block: no carry, no mask.
        tile_rows = m
        acc_rows = m
        num_steps = 1
        tail_rows = m
    else:
        align = max(ACC_ROWS, sub)
        tile_rows = (cap_rows // align) * align
        acc_rows = ACC_ROWS
        num_steps = -(-m // tile_rows)
        tail_rows = m - (num_steps - 1) * tile_rows

    out2d = out_flat.reshape(m, LANES)
    tgt2d = tgt_flat.reshape(m, LANES)

    kernel = functools.partial(_jaccard_kernel, total_n, tail_rows)

    res = pl.pallas_call(
        kernel,
        out_shape=jax.ShapeDtypeStruct((1, 1), jnp.float32),
        grid=(num_steps,),
        in_specs=[
            pl.BlockSpec((tile_rows, LANES), lambda i: (i, 0)),
            pl.BlockSpec((tile_rows, LANES), lambda i: (i, 0)),
        ],
        out_specs=pl.BlockSpec((1, 1), lambda i: (0, 0)),
        scratch_shapes=[pltpu.VMEM((acc_rows, LANES), jnp.float32)],
        compiler_params=pltpu.CompilerParams(
            # accumulator carried across the grid axis -> serial ("arbitrary")
            dimension_semantics=("arbitrary",),
            vmem_limit_bytes=VMEM_LIMIT_BYTES,
        ),
    )(out2d, tgt2d)

    return res[0, 0]


def jaccard_similarity_ref(outputs, targets):
    nom = targets * outputs
    denom = targets + outputs - nom + EPS
    return -jnp.log(jnp.mean(nom / denom + EPS))


if __name__ == "__main__":
    key = jax.random.PRNGKey(0)
    k1, k2 = jax.random.split(key)
    # NCHW: batch=2, channels=4, spatial=16x16; values in [0,1) like sigmoid
    # outputs / soft targets.
    outputs = jax.random.uniform(k1, (2, 4, 16, 16), dtype=jnp.float32)
    targets = jax.random.uniform(k2, (2, 4, 16, 16), dtype=jnp.float32)

    loss = jaccard_similarity(outputs, targets)
    loss = jax.block_until_ready(loss)

    ref = jaccard_similarity_ref(outputs, targets)
    assert jnp.allclose(loss, ref, rtol=1e-5, atol=1e-6), (loss, ref)

    print("KERNEL_OK")
</pallas_src>

<mosaic_0001>
module attributes {stable_mosaic.version = 11 : i64} {
  func.func @_jaccard_kernel(%arg0: i32, %arg1: memref<16x128xf32, #tpu.memory_space<vmem>>, %arg2: memref<16x128xf32, #tpu.memory_space<vmem>>, %arg3: memref<1x1xf32, #tpu.memory_space<vmem>>, %arg4: memref<16x128xf32, #tpu.memory_space<vmem>>) attributes {dimension_semantics = [#tpu.dimension_semantics<arbitrary>], iteration_bounds = array<i64: 1>, scalar_prefetch = 0 : i64, scratch_operands = 1 : i64, tpu.core_type = #tpu.core_type<tc>, window_params = [{transform_indices = @transform_0, window_bounds = array<i64: 16, 128>}, {transform_indices = @transform_1, window_bounds = array<i64: 16, 128>}, {pipeline_mode = #tpu.pipeline_mode<synchronous>, transform_indices = @transform_2, window_bounds = array<i64: 1, 1>}]} {
    %c0_i32 = arith.constant 0 : i32
    %0 = arith.cmpi eq, %arg0, %c0_i32 : i32
    %1 = arith.extui %0 : i1 to i32
    %c0_i32_0 = arith.constant 0 : i32
    %2 = arith.cmpi ne, %1, %c0_i32_0 : i32
    scf.if %2 {
      %cst_8 = arith.constant 0.000000e+00 : f32
      %17 = vector.broadcast %cst_8 : f32 to vector<16x128xf32>
      %c0_9 = arith.constant 0 : index
      %c0_10 = arith.constant 0 : index
      %18 = vector.load %arg4[%c0_9, %c0_10] : memref<16x128xf32, #tpu.memory_space<vmem>>, vector<16x128xf32>
      tpu.vector_store %arg4[%c0_9, %c0_10], %17 {strides = array<i32>} : memref<16x128xf32, #tpu.memory_space<vmem>>, vector<16x128xf32>,
    } else {
    }
    %c0 = arith.constant 0 : index
    %c0_1 = arith.constant 0 : index
    %3 = vector.load %arg1[%c0, %c0_1] : memref<16x128xf32, #tpu.memory_space<vmem>>, vector<16x128xf32>
    %c0_2 = arith.constant 0 : index
    %c0_3 = arith.constant 0 : index
    %4 = vector.load %arg2[%c0_2, %c0_3] : memref<16x128xf32, #tpu.memory_space<vmem>>, vector<16x128xf32>
    %5 = arith.mulf %4, %3 : vector<16x128xf32>
    %6 = arith.addf %4, %3 : vector<16x128xf32>
    %7 = arith.subf %6, %5 : vector<16x128xf32>
    %cst = arith.constant 9.99999974E-6 : f32
    %8 = vector.broadcast %cst : f32 to vector<16x128xf32>
    %9 = arith.addf %7, %8 : vector<16x128xf32>
    %10 = arith.divf %5, %9 : vector<16x128xf32>
    %c0_i32_4 = arith.constant 0 : i32
    %11 = arith.cmpi slt, %arg0, %c0_i32_4 : i32
    %12 = arith.extui %11 : i1 to i32
    %c0_i32_5 = arith.constant 0 : i32
    %13 = arith.cmpi ne, %12, %c0_i32_5 : i32
    scf.if %13 {
      %c0_8 = arith.constant 0 : index
      %c0_9 = arith.constant 0 : index
      %17 = vector.load %arg4[%c0_8, %c0_9] : memref<16x128xf32, #tpu.memory_space<vmem>>, vector<16x128xf32>
      %18 = arith.addf %17, %10 : vector<16x128xf32>
      %c0_10 = arith.constant 0 : index
      %c0_11 = arith.constant 0 : index
      %19 = vector.load %arg4[%c0_10, %c0_11] : memref<16x128xf32, #tpu.memory_space<vmem>>, vector<16x128xf32>
      tpu.vector_store %arg4[%c0_10, %c0_11], %18 {strides = array<i32>} : memref<16x128xf32, #tpu.memory_space<vmem>>, vector<16x128xf32>,
    } else {
    }
    %c0_i32_6 = arith.constant 0 : i32
    %14 = arith.cmpi eq, %arg0, %c0_i32_6 : i32
    %15 = arith.extui %14 : i1 to i32
    %c0_i32_7 = arith.constant 0 : i32
    %16 = arith.cmpi ne, %15, %c0_i32_7 : i32
    scf.if %16 {
      %c0_8 = arith.constant 0 : index
      %c0_9 = arith.constant 0 : index
      %17 = vector.load %arg4[%c0_8, %c0_9] : memref<16x128xf32, #tpu.memory_space<vmem>>, vector<16x128xf32>
      %18 = arith.addf %17, %10 : vector<16x128xf32>
      %c0_10 = arith.constant 0 : index
      %c0_11 = arith.constant 0 : index
      %19 = vector.load %arg4[%c0_10, %c0_11] : memref<16x128xf32, #tpu.memory_space<vmem>>, vector<16x128xf32>
      tpu.vector_store %arg4[%c0_10, %c0_11], %18 {strides = array<i32>} : memref<16x128xf32, #tpu.memory_space<vmem>>, vector<16x128xf32>,
      %c0_12 = arith.constant 0 : index
      %c0_13 = arith.constant 0 : index
      %20 = vector.load %arg4[%c0_12, %c0_13] : memref<16x128xf32, #tpu.memory_space<vmem>>, vector<16x128xf32>
      %21 = vector.shape_cast %20 : vector<16x128xf32> to vector<1x16x128xf32>
      %cst_14 = arith.constant dense<0.000000e+00> : vector<1xf32>
      %22 = vector.multi_reduction <add>, %21, %cst_14 [1, 2] : vector<1x16x128xf32> to vector<1xf32>
      %23 = vector.shape_cast %22 : vector<1xf32> to vector<1x1x1xf32>
      %24 = vector.extract %23[0, 0, 0] : f32 from vector<1x1x1xf32>
      %25 = vector.broadcast %24 : f32 to vector<1x1xf32>
      %cst_15 = arith.constant 2.048000e+03 : f32
      %26 = vector.broadcast %cst_15 : f32 to vector<1x1xf32>
      %27 = arith.divf %25, %26 : vector<1x1xf32>
      %cst_16 = arith.constant 9.99999974E-6 : f32
      %28 = vector.broadcast %cst_16 : f32 to vector<1x1xf32>
      %29 = arith.addf %27, %28 : vector<1x1xf32>
      %30 = math.log %29 : vector<1x1xf32>
      %cst_17 = arith.constant 0.000000e+00 : f32
      %31 = vector.broadcast %cst_17 : f32 to vector<1x1xf32>
      %32 = arith.subf %31, %30 : vector<1x1xf32>
      %c0_18 = arith.constant 0 : index
      %c0_19 = arith.constant 0 : index
      %33 = vector.load %arg3[%c0_18, %c0_19] : memref<1x1xf32, #tpu.memory_space<vmem>>, vector<1x1xf32>
      tpu.vector_store %arg3[%c0_18, %c0_19], %32 {strides = array<i32>} : memref<1x1xf32, #tpu.memory_space<vmem>>, vector<1x1xf32>,
    } else {
    }
    return
  }
  func.func @transform_0(%arg0: i32) -> (i32, i32) {
    %c0_i32 = arith.constant 0 : i32
    %c0_i32_0 = arith.constant 0 : i32
    return %arg0, %c0_i32 : i32, i32
  }
  func.func @transform_1(%arg0: i32) -> (i32, i32) {
    %c0_i32 = arith.constant 0 : i32
    %c0_i32_0 = arith.constant 0 : i32
    return %arg0, %c0_i32 : i32, i32
  }
  func.func @transform_2(%arg0: i32) -> (i32, i32) {
    %c0_i32 = arith.constant 0 : i32
    %c0_i32_0 = arith.constant 0 : i32
    %c0_i32_1 = arith.constant 0 : i32
    return %c0_i32, %c0_i32_0 : i32, i32
  }
}

</mosaic_0001>

<bundles_post_ra>
// kernel: tpu_custom_call.1
= control target key start
LH: loop header
LB: loop body
LE: loop exit
PB: predicated region body
PF: predicated region fallthrough
CT: control target
= control target key end

     0   :  { %7 = vsyncpa [#allocation4], 0  ;;  %s259_s0 = inlined_call_operand.hbm [shape: f32[16,128], index: 0, kind: input, shape index: {}]   ;;  %s260_s1 = inlined_call_operand.hbm [shape: f32[16,128], index: 1, kind: input, shape index: {}]   ;;  %s261_s2 = inlined_call_operand.hbm [shape: f32[1,1], index: 2, kind: output, shape index: {}]  }
   0x1   :  { %8 = vsyncpa [#allocation7], 0 }
   0x2   :  { %9 = vsyncpa [#allocation5], 0  ;;  %s203_s9 = smov [#allocation3]   ;;  %s131_s13 = scalar_lea.hbm %s259_s0, 256 }
   0x3   :  { %s15_s10 = sshll.u32 %s203_s9, 4  ;;  %p132_p0 = scmp.ne.s32.totalorder %s259_s0, %s131_s13  ;;  %s16_s10 = int_to_ptr.vmem [resolvable:$true] %s15_s10 }
   0x4   :  { %p135_p1 = scmp.lt.u32.totalorder %s131_s13, %s259_s0 }
   0x6   :  { %p137_p2 = pnand %p135_p1, %p132_p0 }
   0x8   :  { %140 = shalt.err (!%p137_p2)
}
   0x9   :  { %s141_s18 = scalar_lea.vmem %s16_s10, 256  ;;  %p146_p4 = scmp.lt.s32.totalorder %s16_s10, %s16_s10 }
   0xa   :  { %p142_p3 = scmp.ne.s32.totalorder %s16_s10, %s141_s18  ;;  %p147_p5 = scmp.lt.s32.totalorder %s141_s18, %s141_s18 }
   0xc   :  { %p148_p6 = por %p147_p5, %p146_p4 }
   0xe   :  { %p149_p7 = pnand %p148_p6, %p142_p3 }
  0x10   :  { %152 = shalt.err (!%p149_p7)
}
  0x11   :  { %s204_s19 = smov 128   ;;  %s205_s20 = smov 8  }
  0x12   :  { %21 = dma.hbm_to_vmem [thread:$0]  %s259_s0, 256, %s16_s10, [#allocation4], %s204_s19, %s204_s19, %s205_s20  }
  0x13   :  { %s206_s23 = smov [#allocation6]   ;;  %s153_s27 = scalar_lea.hbm %s260_s1, 256 }
  0x14   :  { %s27_s24 = sshll.u32 %s206_s23, 4  ;;  %p154_p8 = scmp.ne.s32.totalorder %s260_s1, %s153_s27  ;;  %s28_s24 = int_to_ptr.vmem [resolvable:$true] %s27_s24 }
  0x15   :  { %p157_p9 = scmp.lt.u32.totalorder %s153_s27, %s260_s1 }
  0x17   :  { %p159_p10 = pnand %p157_p9, %p154_p8 }
  0x19   :  { %162 = shalt.err (!%p159_p10)
}
  0x1a   :  { %s163_s4 = scalar_lea.vmem %s28_s24, 256  ;;  %p168_p12 = scmp.lt.s32.totalorder %s28_s24, %s28_s24 }
  0x1b   :  { %p164_p11 = scmp.ne.s32.totalorder %s28_s24, %s163_s4  ;;  %p169_p13 = scmp.lt.s32.totalorder %s163_s4, %s163_s4 }
  0x1d   :  { %p170_p0 = por %p169_p13, %p168_p12 }
  0x1f   :  { %p171_p1 = pnand %p170_p0, %p164_p11 }
  0x21   :  { %174 = shalt.err (!%p171_p1)
}
  0x22   :  { %33 = dma.hbm_to_vmem [thread:$0]  %s260_s1, 256, %s28_s24, [#allocation7], %s204_s19, %s204_s19, %s205_s20  }
  0x23   :  { %197 = dma.done.wait [#allocation4], 256  }
  0x24   :  { %198 = vsyncadd [#allocation4], 4294967040 }
  0x25   :  { %199 = dma.done.wait [#allocation7], 256  }
  0x26   :  { %200 = vsyncadd [#allocation7], 4294967040  ;;  %v46_v0 = vld [vmem:[#allocation3] sm:$0xff]  ;;  %v47_v1 = vld [vmem:[#allocation3 + $0x8] sm:$0xff]  ;;  %s207_s6 = smov [#allocation8]   ;;  %vm100_vm0 = vcmask 0  }
  0x27   :  { %v48_v2 = vld [vmem:[#allocation6] sm:$0xff]  ;;  %v49_v3 = vld [vmem:[#allocation6 + $0x8] sm:$0xff]  ;;  %s108_s7 = sshll.u32 %s207_s6, 4  ;;  %s109_s7 = int_to_ptr.vmem [resolvable:$true] %s108_s7 }
  0x28   :  { %v50_v4 = vmul.f32 %v48_v2, %v46_v0  ;;  %v52_v5 = vadd.f32 %v48_v2, %v46_v0  ;;  %v51_v6 = vmul.f32 %v49_v3, %v47_v1  ;;  %v53_v7 = vadd.f32 %v49_v3, %v47_v1  ;;  %s175_s8 = scalar_lea.vmem %s109_s7, 16  ;;  %s179_s9 = scalar_lea.vmem %s109_s7, 32 }
  0x29   :  { %p176_p2 = scmp.ne.s32.totalorder %s109_s7, %s175_s8  ;;  %p180_p3 = scmp.lt.s32.totalorder %s109_s7, %s109_s7 }
  0x2a   :  { %v54_v8 = vsub.f32 %v52_v5, %v50_v4  ;;  %v55_v9 = vsub.f32 %v53_v7, %v51_v6  ;;  %p181_p4 = scmp.lt.s32.totalorder %s179_s9, %s175_s8 }
  0x2c   :  { %v56_v10 = vadd.f32 1e-05, %v54_v8  ;;  %v57_v11 = vadd.f32 1e-05, %v55_v9  ;;  %p182_p5 = por %p181_p4, %p180_p3 }
  0x2e   :  { %125 = vrcp.f32 %v56_v10  ;;  %p183_p6 = pnand %p182_p5, %p176_p2 }
  0x2f   :  { %127 = vrcp.f32 %v57_v11 }
  0x38   :  { %v126_v12 = vpop.eup %125 }
  0x39   :  { %v128_v13 = vpop.eup %127  ;;  %v59_v14 = vmul.f32 %v126_v12, %v50_v4 }
  0x3a   :  { %v61_v15 = vmul.f32 %v128_v13, %v51_v6 }
  0x3c   :  { %v83_v16 = vadd.f32 %v61_v15, %v59_v14 }
  0x3e   :  { %84 = vadd.xlane.f32.xlu0 %v83_v16 }
  0xcb   :  { %v85_v17 = vpop.xlane.xlu0 %84 }
  0xcc   :  { %v86_v18 = vrot.slane %v85_v17, 4 }
  0xce   :  { %v87_v19 = vadd.f32 %v86_v18, %v85_v17 }
  0xd0   :  { %v88_v20 = vrot.slane %v87_v19, 2 }
  0xd2   :  { %v89_v21 = vadd.f32 %v88_v20, %v87_v19 }
  0xd4   :  { %v90_v22 = vrot.slane %v89_v21, 1 }
  0xd6   :  { %v91_v23 = vadd.f32 %v90_v22, %v89_v21 }
  0xd8   :  { %118 = vpush %v91_v23 }
 0x109   :  { %s119_s1 = spop %118 }
 0x10a   :  { %v93_v24 = vstv %s119_s1 }
 0x10b   :  { %v95_v25 = vmul.f32 0.00048828125, %v93_v24 }
 0x10d   :  { %v96_v26 = vadd.f32 1e-05, %v95_v25 }
 0x10f   :  { %129 = vlog2.f32 %v96_v26 }
 0x119   :  { %v130_v27 = vpop.eup %129 }
 0x11a   :  { %v98_v28 = vmul.f32 0.6931472, %v130_v27 }
 0x11c   :  { %v99_v29 = vsub.f32 0.0, %v98_v28 }
 0x11e   :  { %101 = vst.msk [vmem:[#allocation8] sm:$0x1] %vm100_vm0, %v99_v29 }
 0x11f   :  { %186 = shalt.err (!%p183_p6)
}
 0x120   :  { %s187_s12 = scalar_lea.hbm %s261_s2, 16 }
 0x121   :  { %p188_p7 = scmp.ne.s32.totalorder %s261_s2, %s187_s12  ;;  %p191_p8 = scmp.lt.u32.totalorder %s187_s12, %s261_s2 }
 0x123   :  { %p193_p9 = pnand %p191_p8, %p188_p7 }
 0x125   :  { %196 = shalt.err (!%p193_p9)
}
 0x126   :  { %111 = dma.vmem_to_hbm [thread:$0]  %s109_s7, 16, %s261_s2, [#allocation5]  }
 0x127   :  { %201 = dma.done.wait [#allocation5], 16  }
 0x128   :  { %202 = vsyncadd [#allocation5], 4294967280 }
 0x129   :  { %115 = vsyncpa [#allocation4], 1 }
 0x12a   :  { %116 = vsyncpa [#allocation7], 1 }
 0x12b   :  { %117 = vsyncpa [#allocation5], 1 }

</bundles_post_ra>
